<compile_context>
chip_gen: v7x
topology: tpu7x:2x2x1
jax: 0.10.0
libtpu: 0.0.40
codegen_flags: <defaults>
</compile_context>

<pallas_src>
import functools

import jax
import jax.numpy as jnp
from jax.experimental import pallas as pl
from jax.experimental.pallas import tpu as pltpu


# ----------------------------------------------------------------------------
# tiling helpers
# ----------------------------------------------------------------------------
def _choose_tile(dim, pref, align):
    """Largest multiple of `align` that divides `dim` and is <= pref, else dim."""
    if dim <= pref:
        return dim
    t = (pref // align) * align
    while t >= align:
        if dim % t == 0:
            return t
        t -= align
    return dim  # fallback: full dim always satisfies the (8,128) rule


# ----------------------------------------------------------------------------
# Pallas kernels
# ----------------------------------------------------------------------------
def _rmsnorm_matmul_kernel(x_ref, g_ref, w_ref, o_ref, *, eps: float, relu: bool):
    # Fused T5 RMSNorm (fp32 statistics) + bf16 MXU GEMM (+ optional ReLU).
    x = x_ref[...].astype(jnp.float32)                       # (tm, D)
    var = jnp.mean(x * x, axis=-1, keepdims=True)
    normed = x * jax.lax.rsqrt(var + eps) * g_ref[...]        # fp32 norm, HF-style
    y = jnp.dot(normed.astype(jnp.bfloat16), w_ref[...],
                preferred_element_type=jnp.float32)           # fp32 accumulate
    if relu:
        y = jnp.maximum(y, 0.0)
    o_ref[...] = y.astype(o_ref.dtype)


def rmsnorm_matmul_pallas(x, gamma, w, *, relu=False, eps=1e-6,
                          out_dtype=jnp.bfloat16, tm_pref=256, tn_pref=256):
    """rmsnorm(x) @ w, x:(M,D) fp32, gamma:(D,), w:(D,N) bf16 -> (M,N)."""
    M, D = x.shape
    D2, N = w.shape
    assert D == D2
    tm = _choose_tile(M, tm_pref, 8)
    tn = _choose_tile(N, tn_pref, 128)
    g2 = gamma.reshape(1, D).astype(jnp.float32)
    return pl.pallas_call(
        functools.partial(_rmsnorm_matmul_kernel, eps=eps, relu=relu),
        out_shape=jax.ShapeDtypeStruct((M, N), out_dtype),
        grid=(M // tm, N // tn),
        in_specs=[
            pl.BlockSpec((tm, D), lambda i, j: (i, 0)),   # K kept whole: norm needs full D
            pl.BlockSpec((1, D), lambda i, j: (0, 0)),
            pl.BlockSpec((D, tn), lambda i, j: (0, j)),
        ],
        out_specs=pl.BlockSpec((tm, tn), lambda i, j: (i, j)),
        compiler_params=pltpu.CompilerParams(
            dimension_semantics=("parallel", "parallel")),
    )(x, g2, w)


def _matmul_residual_kernel(x_ref, w_ref, r_ref, o_ref, acc_ref):
    @pl.when(pl.program_id(2) == 0)
    def _():
        acc_ref[...] = jnp.zeros_like(acc_ref)

    acc_ref[...] += jnp.dot(x_ref[...], w_ref[...],
                            preferred_element_type=jnp.float32)

    @pl.when(pl.program_id(2) == pl.num_programs(2) - 1)
    def _():
        o_ref[...] = (acc_ref[...] + r_ref[...].astype(jnp.float32)).astype(o_ref.dtype)


def matmul_residual_pallas(x, w, residual, *, tm_pref=256, tn_pref=256, tk_pref=512):
    """x @ w + residual; x:(M,K) bf16, w:(K,N) bf16, residual:(M,N) fp32 -> fp32."""
    M, K = x.shape
    K2, N = w.shape
    assert K == K2 and residual.shape == (M, N)
    tm = _choose_tile(M, tm_pref, 8)
    tn = _choose_tile(N, tn_pref, 128)
    tk = _choose_tile(K, tk_pref, 128)
    return pl.pallas_call(
        _matmul_residual_kernel,
        out_shape=jax.ShapeDtypeStruct((M, N), jnp.float32),
        grid=(M // tm, N // tn, K // tk),
        in_specs=[
            pl.BlockSpec((tm, tk), lambda i, j, k: (i, k)),
            pl.BlockSpec((tk, tn), lambda i, j, k: (k, j)),
            pl.BlockSpec((tm, tn), lambda i, j, k: (i, j)),
        ],
        out_specs=pl.BlockSpec((tm, tn), lambda i, j, k: (i, j)),
        scratch_shapes=[pltpu.VMEM((tm, tn), jnp.float32)],
        compiler_params=pltpu.CompilerParams(
            dimension_semantics=("parallel", "parallel", "arbitrary")),
    )(x, w, residual)


def _attention_kernel(q_ref, k_ref, v_ref, bias_ref, mask_ref, o_ref,
                      *, num_heads: int, head_dim: int):
    # q/k/v refs: (1, S, inner) bf16 views of the fused QKV activation.
    # bias_ref:   (1, H, S, S) fp32 relative-position bias (shared across batch).
    # mask_ref:   (1, 1, S)    fp32 additive attention-mask bias for this batch row.
    S = q_ref.shape[1]
    mask = mask_ref[...].reshape(1, S)                        # (1, S)
    ctx_heads = []
    for h in range(num_heads):                                # static unroll over heads
        sl = pl.ds(h * head_dim, head_dim)
        qh = q_ref[0, :, sl]                                  # (S, Dh) bf16
        kh = k_ref[0, :, sl]
        vh = v_ref[0, :, sl]
        # T5 attention: NO 1/sqrt(d_k) scaling.
        scores = jax.lax.dot_general(
            qh, kh, (((1,), (1,)), ((), ())),
            preferred_element_type=jnp.float32)               # (S, S) fp32
        scores = scores + bias_ref[0, h] + mask
        m = jnp.max(scores, axis=-1, keepdims=True)
        p = jnp.exp(scores - m)
        denom = jnp.sum(p, axis=-1, keepdims=True)
        p = p * pl.reciprocal(denom, approx=True)             # EUP reciprocal, keep div off (S,S)
        ctx_heads.append(jnp.dot(p.astype(vh.dtype), vh,
                                 preferred_element_type=jnp.float32))
    ctx = jnp.concatenate(ctx_heads, axis=-1)                 # (S, inner) — lane-dense store
    o_ref[...] = ctx[None].astype(o_ref.dtype)


def attention_pallas(qkv, pos_bias, mask_bias, *, num_heads, head_dim):
    """qkv: (B,S,3*inner) bf16; pos_bias: (1,H,S,S) fp32; mask_bias: (B,1,S) fp32."""
    B, S, three_inner = qkv.shape
    inner = num_heads * head_dim
    assert three_inner == 3 * inner

    if inner % 128 == 0:
        # q/k/v are lane-block views of the same fused QKV array: no HBM split.
        q_in = k_in = v_in = qkv
        q_map = lambda b: (b, 0, 0)
        k_map = lambda b: (b, 0, 1)
        v_map = lambda b: (b, 0, 2)
    else:
        # Fallback for inner not lane-aligned: split once in JAX.
        q_in = qkv[..., :inner]
        k_in = qkv[..., inner:2 * inner]
        v_in = qkv[..., 2 * inner:]
        q_map = k_map = v_map = lambda b: (b, 0, 0)

    return pl.pallas_call(
        functools.partial(_attention_kernel, num_heads=num_heads, head_dim=head_dim),
        out_shape=jax.ShapeDtypeStruct((B, S, inner), jnp.bfloat16),
        grid=(B,),
        in_specs=[
            pl.BlockSpec((1, S, inner), q_map),
            pl.BlockSpec((1, S, inner), k_map),
            pl.BlockSpec((1, S, inner), v_map),
            pl.BlockSpec((1, num_heads, S, S), lambda b: (0, 0, 0, 0)),  # shared, stays resident
            pl.BlockSpec((1, 1, S), lambda b: (b, 0, 0)),
        ],
        out_specs=pl.BlockSpec((1, S, inner), lambda b: (b, 0, 0)),
        compiler_params=pltpu.CompilerParams(
            dimension_semantics=("parallel",)),
    )(q_in, k_in, v_in, pos_bias, mask_bias)


# ----------------------------------------------------------------------------
# T5 encoder glue (plain JAX around the Pallas kernels)
# ----------------------------------------------------------------------------
def relative_position_bucket(relative_position, num_buckets, max_distance):
    # Bidirectional bucketing, identical to HF T5.
    num_buckets = num_buckets // 2
    relative_buckets = (relative_position > 0).astype(jnp.int32) * num_buckets
    relative_position = jnp.abs(relative_position)
    max_exact = num_buckets // 2
    is_small = relative_position < max_exact
    safe_pos = jnp.maximum(relative_position, 1).astype(jnp.float32)
    rel_if_large = max_exact + (
        jnp.log(safe_pos / max_exact)
        / jnp.log(max_distance / max_exact)
        * (num_buckets - max_exact)
    ).astype(jnp.int32)
    rel_if_large = jnp.minimum(rel_if_large, num_buckets - 1)
    relative_buckets = relative_buckets + jnp.where(
        is_small, relative_position, rel_if_large)
    return relative_buckets


def compute_position_bias(rel_bias_table, seq_len, num_buckets, max_distance):
    ctx_pos = jnp.arange(seq_len, dtype=jnp.int32)[:, None]
    mem_pos = jnp.arange(seq_len, dtype=jnp.int32)[None, :]
    rel_pos = mem_pos - ctx_pos                                   # (S,S)
    buckets = relative_position_bucket(rel_pos, num_buckets, max_distance)
    values = jnp.take(rel_bias_table, buckets, axis=0)            # (S,S,H)
    return jnp.transpose(values, (2, 0, 1))[None].astype(jnp.float32)  # (1,H,S,S)


def t5_encoder_forward(params, cfg, input_ids, attention_mask):
    B, S = input_ids.shape
    D, H = cfg["d_model"], cfg["num_heads"]
    Dh = D // H
    inner = H * Dh
    M = B * S

    hidden2d = jnp.take(params["embedding"], input_ids, axis=0
                        ).astype(jnp.float32).reshape(M, D)       # (M, D) fp32

    # Small additive biases — never broadcast to (B,H,S,S) in HBM.
    pos_bias = compute_position_bias(
        params["rel_bias"], S, cfg["rel_buckets"], cfg["rel_max_distance"])  # (1,H,S,S)
    mask_bias = ((1.0 - attention_mask.astype(jnp.float32))
                 * jnp.finfo(jnp.float32).min).reshape(B, 1, S)              # (B,1,S)

    for layer in params["layers"]:
        # ---- self-attention block: fused RMSNorm + QKV GEMM (bf16 MXU) ----
        qkv = rmsnorm_matmul_pallas(hidden2d, layer["ln1"], layer["wqkv"])   # (M, 3*inner) bf16
        ctx = attention_pallas(qkv.reshape(B, S, 3 * inner), pos_bias, mask_bias,
                               num_heads=H, head_dim=Dh)                     # (B,S,inner) bf16
        # output projection + residual add fused (K-accumulated)
        hidden2d = matmul_residual_pallas(
            ctx.reshape(M, inner), layer["wo"], hidden2d)                    # (M, D) fp32

        # ---- feed-forward block: fused RMSNorm + wi (+ReLU), then wo_ff + residual ----
        h = rmsnorm_matmul_pallas(hidden2d, layer["ln2"], layer["wi"], relu=True)  # (M,F) bf16
        hidden2d = matmul_residual_pallas(h, layer["wo_ff"], hidden2d)             # (M, D) fp32

    return hidden2d.reshape(B, S, D)  # pre final-LN; final LN applied to token 0 below


def codet5_classifier_forward(params, cfg, input_ids, attention_mask):
    hidden = t5_encoder_forward(params, cfg, input_ids, attention_mask)
    cls = hidden[:, 0, :]                                          # (B, D)
    # Final T5 LayerNorm is positionwise, and only token 0 feeds the classifier,
    # so applying it to the (B, D) slice gives identical logits.  Left to XLA
    # (tiny, and num_labels<<128 lanes) per the performance review.
    var = jnp.mean(cls * cls, axis=-1, keepdims=True)
    cls = cls * jax.lax.rsqrt(var + 1e-6) * params["final_ln"][None, :]
    logits = cls @ params["cls_w"].T + params["cls_b"][None, :]
    return logits


# ----------------------------------------------------------------------------
# Deterministic parameter init (synthetic, shapes follow T5EncoderModel config)
# ----------------------------------------------------------------------------
def init_params(key, cfg):
    D, H, F = cfg["d_model"], cfg["num_heads"], cfg["d_ff"]
    inner = D  # num_heads * d_kv == d_model here
    ks = jax.random.split(key, 4 + cfg["num_layers"])
    params = {
        "embedding": jax.random.normal(ks[0], (cfg["vocab"], D), jnp.float32) * 0.02,
        "rel_bias": jax.random.normal(ks[1], (cfg["rel_buckets"], H), jnp.float32) * 0.02,
        "final_ln": jnp.ones((D,), jnp.float32),
        "cls_w": jax.random.normal(ks[2], (cfg["num_labels"], D), jnp.float32) * 0.02,
        "cls_b": jnp.zeros((cfg["num_labels"],), jnp.float32),
        "layers": [],
    }
    for li in range(cfg["num_layers"]):
        lk = jax.random.split(ks[4 + li], 6)
        wq = jax.random.normal(lk[0], (D, inner), jnp.float32) * 0.02
        wk = jax.random.normal(lk[1], (D, inner), jnp.float32) * 0.02
        wv = jax.random.normal(lk[2], (D, inner), jnp.float32) * 0.02
        params["layers"].append({
            "ln1": jnp.ones((D,), jnp.float32),
            # fused QKV weight, stored bf16 for the MXU / halved HBM traffic
            "wqkv": jnp.concatenate([wq, wk, wv], axis=1).astype(jnp.bfloat16),
            "wo": (jax.random.normal(lk[3], (inner, D), jnp.float32) * 0.02
                   ).astype(jnp.bfloat16),
            "ln2": jnp.ones((D,), jnp.float32),
            "wi": (jax.random.normal(lk[4], (D, F), jnp.float32) * 0.02
                   ).astype(jnp.bfloat16),
            "wo_ff": (jax.random.normal(lk[5], (F, D), jnp.float32) * 0.02
                      ).astype(jnp.bfloat16),
        })
    return params


# ----------------------------------------------------------------------------
if __name__ == "__main__":
    cfg = dict(
        vocab=64,
        d_model=128,     # lane-aligned so the fused-QKV lane-block views apply
        num_heads=4,
        d_ff=256,
        num_layers=2,
        num_labels=3,
        rel_buckets=8,
        rel_max_distance=16,
    )
    B, S = 2, 8

    key = jax.random.PRNGKey(0)
    k_param, k_ids = jax.random.split(key)
    params = init_params(k_param, cfg)

    input_ids = jax.random.randint(k_ids, (B, S), 0, cfg["vocab"], dtype=jnp.int32)
    attention_mask = jnp.array(
        [[1, 1, 1, 1, 1, 1, 1, 1],
         [1, 1, 1, 1, 1, 1, 0, 0]], dtype=jnp.int32)

    logits = codet5_classifier_forward(params, cfg, input_ids, attention_mask)
    logits = jax.block_until_ready(logits)

    assert logits.shape == (B, cfg["num_labels"])
    assert logits.dtype == jnp.float32
    assert bool(jnp.all(jnp.isfinite(logits)))
    print("KERNEL_OK")
</pallas_src>

<mosaic_0001>
module attributes {stable_mosaic.version = 11 : i64} {
  func.func @_rmsnorm_matmul_kernel(%arg0: i32, %arg1: i32, %arg2: memref<16x128xf32, #tpu.memory_space<vmem>>, %arg3: memref<1x128xf32, #tpu.memory_space<vmem>>, %arg4: memref<128x128xbf16, #tpu.memory_space<vmem>>, %arg5: memref<16x128xbf16, #tpu.memory_space<vmem>>) attributes {dimension_semantics = [#tpu.dimension_semantics<parallel>, #tpu.dimension_semantics<parallel>], iteration_bounds = array<i64: 1, 3>, scalar_prefetch = 0 : i64, scratch_operands = 0 : i64, tpu.core_type = #tpu.core_type<tc>, window_params = [{transform_indices = @transform_0, window_bounds = array<i64: 16, 128>}, {pipeline_mode = #tpu.pipeline_mode<synchronous>, transform_indices = @transform_1, window_bounds = array<i64: 1, 128>}, {transform_indices = @transform_2, window_bounds = array<i64: 128, 128>}, {transform_indices = @transform_3, window_bounds = array<i64: 16, 128>}]} {
    %c0 = arith.constant 0 : index
    %c0_0 = arith.constant 0 : index
    %0 = vector.load %arg2[%c0, %c0_0] : memref<16x128xf32, #tpu.memory_space<vmem>>, vector<16x128xf32>
    %1 = arith.mulf %0, %0 : vector<16x128xf32>
    %cst = arith.constant dense<0.000000e+00> : vector<16xf32>
    %2 = vector.multi_reduction <add>, %1, %cst [1] : vector<16x128xf32> to vector<16xf32>
    %3 = vector.shape_cast %2 : vector<16xf32> to vector<16x1xf32>
    %cst_1 = arith.constant 1.280000e+02 : f32
    %4 = vector.broadcast %cst_1 : f32 to vector<16x1xf32>
    %5 = arith.divf %3, %4 : vector<16x1xf32>
    %cst_2 = arith.constant 9.99999997E-7 : f32
    %6 = vector.broadcast %cst_2 : f32 to vector<16x1xf32>
    %7 = arith.addf %5, %6 : vector<16x1xf32>
    %8 = math.rsqrt %7 : vector<16x1xf32>
    %9 = vector.broadcast %8 : vector<16x1xf32> to vector<16x128xf32>
    %10 = arith.mulf %0, %9 : vector<16x128xf32>
    %c0_3 = arith.constant 0 : index
    %c0_4 = arith.constant 0 : index
    %11 = vector.load %arg3[%c0_3, %c0_4] : memref<1x128xf32, #tpu.memory_space<vmem>>, vector<1x128xf32>
    %12 = vector.broadcast %11 : vector<1x128xf32> to vector<16x128xf32>
    %13 = arith.mulf %10, %12 : vector<16x128xf32>
    %14 = arith.truncf %13 : vector<16x128xf32> to vector<16x128xbf16>
    %c0_5 = arith.constant 0 : index
    %c0_6 = arith.constant 0 : index
    %15 = vector.load %arg4[%c0_5, %c0_6] : memref<128x128xbf16, #tpu.memory_space<vmem>>, vector<128x128xbf16>
    %cst_7 = arith.constant dense<0.000000e+00> : vector<16x128xf32>
    %16 = tpu.matmul %14, %15, %cst_7 {dimension_numbers = #tpu.dot_dimension_numbers<[1], [0], [0], [1], [0, 0, 1, 1], [], []>} : vector<16x128xbf16>, vector<128x128xbf16>, vector<16x128xf32> -> vector<16x128xf32>
    %17 = arith.truncf %16 : vector<16x128xf32> to vector<16x128xbf16>
    %c0_8 = arith.constant 0 : index
    %c0_9 = arith.constant 0 : index
    %18 = vector.load %arg5[%c0_8, %c0_9] : memref<16x128xbf16, #tpu.memory_space<vmem>>, vector<16x128xbf16>
    tpu.vector_store %arg5[%c0_8, %c0_9], %17 {strides = array<i32>} : memref<16x128xbf16, #tpu.memory_space<vmem>>, vector<16x128xbf16>,
    return
  }
  func.func @transform_0(%arg0: i32, %arg1: i32) -> (i32, i32) {
    %c0_i32 = arith.constant 0 : i32
    %c0_i32_0 = arith.constant 0 : i32
    return %arg0, %c0_i32 : i32, i32
  }
  func.func @transform_1(%arg0: i32, %arg1: i32) -> (i32, i32) {
    %c0_i32 = arith.constant 0 : i32
    %c0_i32_0 = arith.constant 0 : i32
    %c0_i32_1 = arith.constant 0 : i32
    return %c0_i32, %c0_i32_0 : i32, i32
  }
  func.func @transform_2(%arg0: i32, %arg1: i32) -> (i32, i32) {
    %c0_i32 = arith.constant 0 : i32
    %c0_i32_0 = arith.constant 0 : i32
    return %c0_i32, %arg1 : i32, i32
  }
  func.func @transform_3(%arg0: i32, %arg1: i32) -> (i32, i32) {
    %c0_i32 = arith.constant 0 : i32
    return %arg0, %arg1 : i32, i32
  }
}

</mosaic_0001>

<bundles_post_ra>
// kernel: tpu_custom_call.1
= control target key start
LH: loop header
LB: loop body
LE: loop exit
PB: predicated region body
PF: predicated region fallthrough
CT: control target
= control target key end

     0   :  { %8 = vsyncpa [#allocation3], 0  ;;  %s1044_s0 = inlined_call_operand.hbm [shape: f32[16,128], index: 0, kind: input, shape index: {}]   ;;  %s1045_s1 = inlined_call_operand.vmem [shape: f32[1,128], index: 1, kind: input, shape index: {}]   ;;  %s1046_s2 = inlined_call_operand.hbm [shape: bf16[128,384], index: 2, kind: input, shape index: {}]   ;;  %s1047_s3 = inlined_call_operand.hbm [shape: bf16[16,384], index: 3, kind: output, shape index: {}]  }
   0x1   :  { %9 = vsyncpa [#allocation6], 0 }
   0x2   :  { %11 = vsyncpa [#allocation6 + $0x1], 0 }
   0x3   :  { %12 = vsyncpa [#allocation4], 0 }
   0x4   :  { %14 = vsyncpa [#allocation4 + $0x1], 0  ;;  %s819_s12 = smov 0   ;;  %s821_s13 = smov 0  }
   0x5   :  { %s823_s14 = smov 0   ;;  %s825_s15 = smov 0  }
   0x6   :  { %s827_s16 = smov 0   ;;  %s829_s17 = smov 0  }
   0x7 LB: > { %s483_s18 = sadd.s32 4294967295, %s784_s17   ;;  %s484_s19 = sadd.s32 4294967294, %s784_s17   ;;  %s784_s17 = sphi %s829_s17, %s20_s17   ;;  %s780_s16 = sphi %s827_s16, %s1072_s16   ;;  %s776_s15 = sphi %s825_s15, %s1071_s15   ;;  %s772_s14 = sphi %s823_s14, %s1070_s14   ;;  %s768_s13 = sphi %s821_s13, %s1069_s13   ;;  %s764_s12 = sphi %s819_s12, %s1068_s12  }
   0x8   : > { %p93_p0 = scmp.ne.s32.totalorder %s772_s14, %s768_s13  ;;  %p94_p1 = scmp.eq.s32.totalorder %s784_s17, 0 }
   0x9   : > { %p99_p2 = scmp.ne.s32.totalorder %s768_s13, %s764_s12  ;;  %p856_p3 = scmp.eq.s32.totalorder %s483_s18, 0 }
   0xa   : > { %p860_p4 = por %p94_p1, %p93_p0  ;;  %p125_p5 = scmp.eq.s32.totalorder %s483_s18, 2 }
   0xb   : > { %s1054_s20 = scalar_select %p856_p3, 1, 0 }
   0xc   : > { %p866_p6 = por %p856_p3, %p99_p2  ;;  %p131_p7 = scmp.eq.s32.totalorder %s484_s19, 2 }
   0xd   : > { %p870_p8 = por %p125_p5, %p93_p0  ;;  %p485_p9 = scmp.ge.s32.totalorder %s784_s17, 1 }
   0xe   : > { %s1056_s22 = scalar_select %p866_p6, 1, 0 }
   0xf   : > { %s1057_s23 = scalar_select %p870_p8, 1, 0 }
  0x10   : > { %p875_p10 = por %p131_p7, %p99_p2  ;;  %p138_p11 = scmp.lt.s32.totalorder %s784_s17, 4 }
  0x11   : > { %s786_s26 = smov [#allocation2]   ;;  %p566_p0 = scmp.lt.s32.totalorder %s784_s17, 3 }
  0x12   : > { %s1058_s24 = scalar_select %p875_p10, 1, 0 }
  0x13   : > { %p880_p12 = pnand %p485_p9, %p138_p11  ;;  %s153_s27 = sshll.u32 %s786_s26, 4  ;;  %s154_s27 = int_to_ptr.vmem [resolvable:$true] %s153_s27 }
  0x14   : > { %p895_p2 = pnand %p566_p0, %p860_p4  ;;  %s29_s30 = sadd.s32 1, %s780_s16 }
  0x15   : > { %s1059_s25 = scalar_select %p880_p12, 1, 0 }
  0x16   : > { %p553_p13 = pneg %p880_p12  ;;  %s640_s6 = scalar_lea.hbm %s1044_s0, 256 }
  0x17   : > { %s1061_s29 = scalar_select %p895_p2, 1, 0 }
  0x18   : > { %p889_p1 = pnand %p553_p13, %p856_p3  ;;  %p641_p5 = scmp.ne.s32.totalorder %s1044_s0, %s640_s6 }
  0x19   : > { %p647_p4 = scmp.lt.u32.totalorder %s640_s6, %s1044_s0 }
  0x1a   : > { %p642_p7 = pneg %p889_p1 }
  0x1c   : > { %p643_p9 = pnand %p642_p7, %p641_p5 }
  0x1e   : > { %p644_p11 = pneg %p643_p9 }
  0x20   : > { %p649_p13 = pnand %p647_p4, %p644_p11 }
  0x22   : > { %652 = shalt.err (!%p649_p13)
}
  0x23   : > { %s653_s11 = scalar_lea.vmem %s154_s27, 256  ;;  %p661_p6 = scmp.lt.s32.totalorder %s154_s27, %s154_s27 }
  0x24   : > { %p654_p0 = scmp.ne.s32.totalorder %s154_s27, %s653_s11  ;;  %p662_p3 = scmp.lt.s32.totalorder %s653_s11, %s653_s11 }
  0x26   : > { %p656_p10 = pnand %p654_p0, %p642_p7  ;;  %p663_p12 = por %p662_p3, %p661_p6 }
  0x28   : > { %p657_p8 = pneg %p656_p10 }
  0x2a   : > { %p664_p2 = pnand %p663_p12, %p657_p8 }
  0x2c   : > { %667 = shalt.err (!%p664_p2)
}
  0x2d   : > { %s787_s18 = smov 128   ;;  %s788_s19 = smov 8  }
  0x2e   : > { %556 = dma.hbm_to_vmem [thread:$0]  (!%p889_p1), %s1044_s0, 256, %s154_s27, [#allocation3], %s787_s18, %s787_s18, %s788_s19  }
  0x2f   : > { %p30_p5 = scmp.ge.s32.totalorder %s29_s30, 3  ;;  %s86_s4 = sadd.s32 1, %s772_s14 }
  0x30   : > { %s170_s5 = sand.u32 1, %s772_s14   ;;  %s489_s8 = sshll.u32 %s780_s16, 6 }
  0x31   : > { %s1074_s30 = smov (%p30_p5, %s29_s30), 0  ;;  %s488_s6 = sshll.u32 %s170_s5, 6 }
  0x32   : > { %s83_s7 = ssub.s32 %s780_s16, %s1074_s30  ;;  %s926_s28 = scalar_lea.hbm %s1046_s2, %s489_s8 }
  0x33   : > { %p84_p3 = scmp.eq.s32.totalorder %s83_s7, 0  ;;  %s174_s27 = scalar_lea.vmem [#allocation5], %s488_s6 }
  0x34   : > { %s180_s11 = sshll.u32 %s174_s27, 4  ;;  %s933_s19 = scalar_lea.sflag [#allocation6], %s170_s5  ;;  %s931_s11 = int_to_ptr.vmem [resolvable:$true] %s180_s11 }
  0x35   : > { %s929_s18 = scalar_select %p84_p3, %s772_s14, %s86_s4  }
  0x36   : > { %s668_s21 = scalar_lea.hbm %s926_s28, 1024  ;;  %p1062_p8 = scmp.ne.s32.totalorder %s1061_s29, 0 }
  0x37   : > { %p669_p6 = scmp.ne.s32.totalorder %s926_s28, %s668_s21  ;;  %s673_s8 = scalar_lea.hbm %s1046_s2, 3072 }
  0x38   : > { %p670_p10 = pneg %p1062_p8  ;;  %p674_p2 = scmp.lt.u32.totalorder %s926_s28, %s1046_s2 }
  0x39   : > { %p675_p7 = scmp.lt.u32.totalorder %s673_s8, %s668_s21  ;;  %p677_p11 = scmp.lt.u32.totalorder %s668_s21, %s926_s28 }
  0x3a   : > { %p671_p12 = pnand %p670_p10, %p669_p6 }
  0x3b   : > { %p676_p9 = por %p675_p7, %p674_p2 }
  0x3c   : > { %p672_p1 = pneg %p671_p12 }
  0x3d   : > { %p678_p4 = por %p677_p11, %p676_p9 }
  0x3f   : > { %p679_p13 = pnand %p678_p4, %p672_p1 }
  0x41   : > { %682 = shalt.err (!%p679_p13)
}
  0x42   : > { %s683_s4 = scalar_lea.vmem %s931_s11, 1024  ;;  %s789_s5 = smov [#allocation5]  }
  0x43   : > { %p684_p0 = scmp.ne.s32.totalorder %s931_s11, %s683_s4  ;;  %s688_s10 = sshll.u32 %s789_s5, 4  ;;  %s689_s10 = int_to_ptr.vmem [resolvable:$false] %s688_s10 }
  0x44   : > { %s690_s27 = scalar_lea.vmem %s689_s10, 2048  ;;  %p691_p6 = scmp.lt.s32.totalorder %s931_s11, %s689_s10 }
  0x45   : > { %p686_p5 = pnand %p684_p0, %p670_p10  ;;  %p692_p12 = scmp.lt.s32.totalorder %s690_s27, %s683_s4 }
  0x47   : > { %p687_p3 = pneg %p686_p5  ;;  %p693_p2 = por %p692_p12, %p691_p6 }
  0x49   : > { %p694_p7 = pnand %p693_p2, %p687_p3 }
  0x4b   : > { %697 = shalt.err (!%p694_p7)
}
  0x4c   : > { %s790_s21 = smov 192   ;;  %s791_s26 = smov 64  }
  0x4d   : > { %s792_s7 = smov 4   ;;  %p1063_p10 = scmp.ne.s32.totalorder %s1059_s25, 0 }
  0x4e   : > { %560 = dma.hbm_to_vmem [thread:$0]  (!%p1062_p8), %s926_s28, 1024, %s931_s11, %s933_s19, %s790_s21, %s791_s26, %s792_s7  }
  0x4f   : > { %192 = sbr.rel (%p1063_p10) target bundleno = 493 (0x1ed), region = 32  ;;  %p1064_p1 = scmp.ne.s32.totalorder (!%p1063_p10), %s1054_s20, 0 }
  0x56   : > { %751 = dma.done.wait (%p1064_p1), [#allocation3], 256  }
  0x57   : > { %753 = vsyncadd (%p1064_p1), [#allocation3], 4294967040  ;;  %s968_s8 = sand.u32 1, %s768_s13   ;;  %p1065_p8 = scmp.ne.s32.totalorder %s1056_s22, 0 }
  0x58   : > { %s492_s6 = sshll.u32 %s968_s8, 6  ;;  %s199_s9 = scalar_lea.sflag [#allocation6], %s968_s8 }
  0x59   : > { %s972_s4 = scalar_lea.vmem [#allocation5], %s492_s6 }
  0x5a   : > { %755 = dma.done.wait (%p1065_p8), %s199_s9, 1024  }
  0x5b   : > { %757 = vsyncadd (%p1065_p8), %s199_s9, 4294966272  ;;  %v793_v0 = vmov 0.0   ;;  %v228_v1 = vld [vmem:[#allocation2] sm:$0xff]  ;;  %v229_v2 = vld [vmem:[#allocation2 + $0x8] sm:$0xff]  ;;  %vm794_vm0 = vmmov 0   ;;  %s493_s25 = sshll.u32 %s968_s8, 3 }
  0x5c   : > { %525 = vmatprep.subr.bf16.mxu0 %v793_v0  ;;  %v230_v3 = vmul.f32 %v228_v1, %v228_v1  ;;  %v628_v4 = vld [vmem:[%s972_s4] sm:$0xff]   ;;  %v629_v5 = vld [vmem:[%s972_s4 + $0x8] sm:$0xff]   ;;  %v231_v6 = vmul.f32 %v229_v2, %v229_v2  ;;  %v630_v7 = vld [vmem:[%s972_s4 + $0x10] sm:$0xff]   ;;  %541 = vmatprep.mubr.msk.bf16.mxu0 %vm794_vm0, %v793_v0  ;;  %s224_s29 = scalar_lea.vmem [#allocation7], %s493_s25  ;;  %s506_s11 = sshll.u32 %s776_s15, 6 }
  0x5d   : > { %526 = vmatpush3.bf16.msra.mxu0 %v628_v4  ;;  %v631_v8 = vld [vmem:[%s972_s4 + $0x18] sm:$0xff]   ;;  %v632_v9 = vld [vmem:[%s972_s4 + $0x20] sm:$0xff]   ;;  %v633_v10 = vld [vmem:[%s972_s4 + $0x28] sm:$0xff]   ;;  %s386_s28 = sshll.u32 %s224_s29, 4  ;;  %s996_s10 = scalar_lea.hbm %s1047_s3, %s506_s11  ;;  %s991_s28 = int_to_ptr.vmem [resolvable:$true] %s386_s28 }
  0x5e   : > { %232 = vadd.xlane.f32.xlu0 %v230_v3  ;;  %527 = vmatprep.subr.bf16.mxu0 %v793_v0  ;;  %v634_v11 = vld [vmem:[%s972_s4 + $0x30] sm:$0xff]   ;;  %v635_v12 = vld [vmem:[%s972_s4 + $0x38] sm:$0xff]   ;;  %s371_s27 = scalar_lea.sflag [#allocation4], %s968_s8  ;;  %s698_s21 = scalar_lea.vmem %s991_s28, 128 }
  0x5f   : > { %v494_v22 = vld [vmem:[%s1045_s1] ss:$0 sm:$0xff]  ;;  %p699_p9 = scmp.ne.s32.totalorder %s991_s28, %s698_s21  ;;  %p1066_p11 = scmp.ne.s32.totalorder %s1057_s23, 0 }
  0x60   : > { %s795_s15 = smov [#allocation7]  }
  0x61   : > { %528 = vmatpush3.bf16.msra.mxu0 %v629_v5  ;;  %p700_p4 = pnand %p699_p9, %p1066_p11  ;;  %s702_s26 = sshll.u32 %s795_s15, 4  ;;  %s703_s26 = int_to_ptr.vmem [resolvable:$false] %s702_s26 }
  0x62   : > { %234 = vadd.xlane.f32.xlu0 %v231_v6  ;;  %529 = vmatprep.subr.bf16.mxu0 %v793_v0  ;;  %s704_s7 = scalar_lea.vmem %s703_s26, 256  ;;  %p705_p0 = scmp.lt.s32.totalorder %s991_s28, %s703_s26 }
  0x63   : > { %p701_p13 = pneg %p700_p4  ;;  %p706_p5 = scmp.lt.s32.totalorder %s704_s7, %s698_s21 }
  0x65   : > { %530 = vmatpush3.bf16.msra.mxu0 %v630_v7  ;;  %p707_p3 = por %p706_p5, %p705_p0 }
  0x66   : > { %531 = vmatprep.subr.bf16.mxu0 %v793_v0 }
  0x67   : > { %p708_p6 = pnand %p707_p3, %p701_p13 }
  0x69   : > { %532 = vmatpush3.bf16.msra.mxu0 %v631_v8 }
  0x6a   : > { %533 = vmatprep.subr.bf16.mxu0 %v793_v0 }
  0x6d   : > { %534 = vmatpush3.bf16.msra.mxu0 %v632_v9 }
  0x6e   : > { %535 = vmatprep.subr.bf16.mxu0 %v793_v0 }
  0x71   : > { %536 = vmatpush3.bf16.msra.mxu0 %v633_v10 }
  0x72   : > { %537 = vmatprep.subr.bf16.mxu0 %v793_v0 }
  0x75   : > { %538 = vmatpush3.bf16.msra.mxu0 %v634_v11 }
  0x76   : > { %539 = vmatprep.subr.bf16.mxu0 %v793_v0 }
  0x79   : > { %540 = vmatpush3.bf16.msra.mxu0 %v635_v12 }
  0xeb   : > { %v233_v13 = vpop.xlane.xlu0 %232 }
  0xec   : > { %v237_v14 = vmul.f32 0.0078125, %v233_v13 }
  0xee   : > { %v239_v15 = vadd.f32 1e-06, %v237_v14 }
  0xef   : > { %v235_v16 = vpop.xlane.xlu0 %234 }
  0xf0   : > { %636 = vrsqrt.f32 %v239_v15  ;;  %v238_v17 = vmul.f32 0.0078125, %v235_v16 }
  0xf2   : > { %v240_v18 = vadd.f32 1e-06, %v238_v17 }
  0xf4   : > { %638 = vrsqrt.f32 %v240_v18 }
  0xfa   : > { %v637_v19 = vpop.eup %636 }
  0xfb   : > { %v243_v20 = vmul.f32 %v637_v19, %v228_v1 }
  0xfd   : > { %v252_v24 = vmul.f32 %v494_v22, %v243_v20 }
  0xfe   : > { %v639_v21 = vpop.eup %638 }
  0xff   : > { %v244_v23 = vmul.f32 %v639_v21, %v229_v2 }
 0x101   : > { %v253_v25 = vmul.f32 %v494_v22, %v244_v23 }
 0x103   : > { %v254_v26 = vpack.c.bf16 %v253_v25, %v252_v24 }
 0x105   : > { %542 = vmatmul.mubr.bf16.vlgmr.msra.gmra.mrb[0].mxu0 %v254_v26 }
 0x1d8   : > { %v353_v27 = vpop.f32.mrb[0].mxu0 }
 0x1d9   : > { %v543_v28 = vpop.f32.mrb[1].mxu0 }
 0x1da   : > { %v356_v29 = vpop.f32.mrb[2].mxu0 }
 0x1db   : > { %v514_v30 = vpack.c.bf16 %v356_v29, %v353_v27  ;;  %v544_v31 = vpop.f32.mrb[3].mxu0 }
 0x1dd   : > { %515 = vst [vmem:[%s224_s29] sm:$0xff] %v514_v30  }
 0x1de   : > { %711 = shalt.err (!%p708_p6)
}
 0x1df   : > { %s712_s6 = scalar_lea.hbm %s996_s10, 128  ;;  %s716_s20 = scalar_lea.hbm %s1047_s3, 384 }
 0x1e0   : > { %p713_p12 = scmp.ne.s32.totalorder %s996_s10, %s712_s6  ;;  %p717_p10 = scmp.lt.u32.totalorder %s996_s10, %s1047_s3 }
 0x1e1   : > { %p718_p1 = scmp.lt.u32.totalorder %s716_s20, %s712_s6  ;;  %p720_p9 = scmp.lt.u32.totalorder %s712_s6, %s996_s10 }
 0x1e2   : > { %p714_p2 = pnand %p713_p12, %p1066_p11 }
 0x1e3   : > { %p719_p8 = por %p718_p1, %p717_p10 }
 0x1e4   : > { %p715_p7 = pneg %p714_p2 }
 0x1e5   : > { %p721_p4 = por %p720_p9, %p719_p8 }
 0x1e7   : > { %p722_p13 = pnand %p721_p4, %p715_p7 }
 0x1e9   : > { %725 = shalt.err (!%p722_p13)
}
 0x1ea   : > { %s796_s29 = smov 64   ;;  %s797_s11 = smov 192  }
 0x1eb   : > { %s798_s19 = smov 4  }
 0x1ec   : > { %551 = dma.vmem_to_hbm [thread:$0]  (%p1066_p11), %s991_s28, 128, %s996_s10, %s371_s27, %s796_s29, %s797_s11, %s798_s19  }
 0x1ed PF: > { %p568_p0 = scmp.ge.s32.totalorder %s784_s17, 2  ;;  %s401_s5 = sand.u32 1, %s764_s12  }
 0x1ee   : > { %p1067_p5 = scmp.ne.s32.totalorder %s1058_s24, 0  ;;  %s402_s21 = scalar_lea.sflag [#allocation4], %s401_s5 }
 0x1f0   : > { %p562_p3 = pnand %p568_p0, %p1067_p5 }
 0x1f2   : > { %759 = dma.done.wait (!%p562_p3), %s402_s21, 128  }
 0x1f3   : > { %761 = vsyncadd (!%p562_p3), %s402_s21, 4294967168  ;;  %s20_s17 = sadd.s32 1, %s784_s17   ;;  %s1068_s12 = smov %s768_s13 }
 0x1f4   : > { %p17_p6 = scmp.ge.s32.totalorder %s20_s17, 5   ;;  %s1069_s13 = smov %s772_s14 }
 0x1f5   : > { %s1070_s14 = smov %s929_s18  ;;  %s1071_s15 = smov %s780_s16 }
 0x1f6   : > { %s1072_s16 = smov %s1074_s30  ;;  %19 = sbr.rel (!%p17_p6) target bundleno = 7 (0x7), region = 83 }
 0x1fd   :  { %407 = vsyncpa [#allocation3], 1 }
 0x1fe   :  { %409 = vsyncpa [#allocation3 + $0x1], 1 }
 0x1ff   :  { %410 = vsyncpa [#allocation6], 1 }
 0x200   :  { %412 = vsyncpa [#allocation6 + $0x1], 1 }
 0x201   :  { %413 = vsyncpa [#allocation4], 1 }
 0x202   :  { %415 = vsyncpa [#allocation4 + $0x1], 1 }

</bundles_post_ra>
